<compile_context>
chip_gen: v5e
topology: v5e:2x2
jax: 0.10.0
libtpu: 0.0.40
codegen_flags: <defaults>
</compile_context>

<pallas_src>
import jax
import jax.numpy as jnp
from jax import lax
from jax.experimental import pallas as pl
from jax.experimental.pallas import tpu as pltpu

_ALIGN = 32  # bond-tile sublane alignment, safe for f32 and bf16 blocks


def _round_up(x, m):
    return ((x + m - 1) // m) * m


def _tensorcores_per_chip():
    """Best-effort TensorCore count (2 on v7x); falls back to 1 (no forced split)."""
    try:
        info = pltpu.get_tpu_info()
    except Exception:
        return 1
    for name in ("num_cores", "num_tensorcores", "tensorcore_count", "core_count"):
        v = getattr(info, name, None)
        if isinstance(v, int) and v > 0:
            return v
    return 1


# ----------------------------------------------------------------------------
# Kernel A — in-kernel gather (small n_atoms).  Streams only src/dst indices.
#   G_src = h @ W1f[:hidden]   (precomputed, resident)   [n_atoms_pad, 2*h1]
#   G_dst = h @ W1f[hidden:]   (precomputed, resident)   [n_atoms_pad, 2*h1]
#   a     = onehot(src) @ G_src + onehot(dst) @ G_dst + [b1|b1]
#   out   = (relu(a[:, :h1]) + relu(a[:, h1:])) @ W2 + 2*b2
# ----------------------------------------------------------------------------
def _pool_bond_gather_kernel(src_ref, dst_ref, g_src_ref, g_dst_ref,
                             b1f_ref, w2_ref, two_b2_ref, o_ref):
    tile = src_ref.shape[0]
    n_atoms_pad = g_src_ref.shape[0]
    h1 = w2_ref.shape[0]

    iota = lax.broadcasted_iota(jnp.int32, (tile, n_atoms_pad), 1)
    oh_src = (iota == src_ref[...]).astype(jnp.float32)   # [tile, n_atoms_pad]
    oh_dst = (iota == dst_ref[...]).astype(jnp.float32)

    a = (jnp.dot(oh_src, g_src_ref[...], preferred_element_type=jnp.float32)
         + jnp.dot(oh_dst, g_dst_ref[...], preferred_element_type=jnp.float32)
         + b1f_ref[...])                                   # [tile, 2*h1]

    s = jnp.maximum(a[:, :h1], 0.0) + jnp.maximum(a[:, h1:], 0.0)
    out = jnp.dot(s, w2_ref[...], preferred_element_type=jnp.float32) + two_b2_ref[...]
    o_ref[...] = out.astype(o_ref.dtype)


# ----------------------------------------------------------------------------
# Kernel B — streamed-x fallback (large n_atoms).  x = [h_src || h_dst] in bf16.
#   a   = x @ [W1 | W1_rowswapped] + [b1|b1]
#   out = (relu(a[:, :h1]) + relu(a[:, h1:])) @ W2 + 2*b2
# ----------------------------------------------------------------------------
def _pool_bond_x_kernel(x_ref, w1f_ref, b1f_ref, w2_ref, two_b2_ref, o_ref):
    h1 = w2_ref.shape[0]
    a = jnp.dot(x_ref[...], w1f_ref[...],
                preferred_element_type=jnp.float32) + b1f_ref[...]
    s = (jnp.maximum(a[:, :h1], 0.0) + jnp.maximum(a[:, h1:], 0.0)).astype(w2_ref.dtype)
    out = jnp.dot(s, w2_ref[...], preferred_element_type=jnp.float32) + two_b2_ref[...]
    o_ref[...] = out.astype(o_ref.dtype)


def pool_bond_features(h, src, dst, w1, b1, w2, b2, *,
                       tile_bonds=1024, gather_in_kernel=None,
                       compute_dtype=jnp.bfloat16):
    """Forward pass of PoolBondFeatures.

    h   : [n_atoms, hidden]   node features produced by the GCN stack
    src : [n_bonds]           source node index of each (forward) bond
    dst : [n_bonds]           destination node index of each (forward) bond
    w1  : [2*hidden, h1], b1 : [h1]     (SequentialLayers: Linear -> ReLU -> Linear)
    w2  : [h1, out_dim],  b2 : [out_dim]
    returns [n_bonds, out_dim]
    """
    n_bonds = int(src.shape[0])
    n_atoms, hidden = h.shape
    h1 = int(w1.shape[1])
    out_dim = int(w2.shape[1])
    out_dtype = h.dtype

    if n_bonds == 0:
        return jnp.zeros((0, out_dim), out_dtype)

    # Fused layer-1 weight [W1 | W1_rowswapped]  (concat([h_v,h_u]) @ W1 ==
    # concat([h_u,h_v]) @ W1_rowswapped) and shared biases.
    w1_sw = jnp.concatenate([w1[hidden:, :], w1[:hidden, :]], axis=0)
    w1f = jnp.concatenate([w1, w1_sw], axis=1)                         # [2*hidden, 2*h1]
    b1f = jnp.concatenate([b1, b1]).reshape(1, 2 * h1).astype(jnp.float32)
    two_b2 = (b2.astype(jnp.float32) * 2.0).reshape(1, out_dim)

    # --- tile selection ------------------------------------------------------
    tile = max(_ALIGN, min(int(tile_bonds), _round_up(n_bonds, _ALIGN)))
    tile = _round_up(tile, _ALIGN)
    n_pad = _round_up(n_bonds, tile)
    # Split a single huge tile across two TensorCores only where two exist (v7x)
    # and only when each half stays >= 512 rows.
    if (n_pad // tile) == 1 and n_pad >= 1024 and _tensorcores_per_chip() >= 2:
        tile = _round_up(pl.cdiv(n_pad, 2), _ALIGN)
        n_pad = _round_up(n_bonds, tile)
    grid = (n_pad // tile,)

    if gather_in_kernel is None:
        # One-hot MXU gather is only profitable while n_atoms stays small.
        gather_in_kernel = n_atoms <= 256

    compiler_params = pltpu.CompilerParams(dimension_semantics=("parallel",))

    if gather_in_kernel:
        # ---- Path A: stream int32 indices, gather in-kernel via one-hot MXU ----
        n_atoms_pad = max(8, _round_up(n_atoms, 8))
        h_f = h.astype(jnp.float32)
        if n_atoms_pad != n_atoms:
            h_f = jnp.pad(h_f, ((0, n_atoms_pad - n_atoms), (0, 0)))
        # Tiny precompute (n_atoms-sized); keeps the layer-1 weight out of the kernel.
        g_src = h_f @ w1f[:hidden, :].astype(jnp.float32)              # [n_atoms_pad, 2*h1]
        g_dst = h_f @ w1f[hidden:, :].astype(jnp.float32)

        pad = n_pad - n_bonds
        src_p = jnp.pad(src.astype(jnp.int32), (0, pad)).reshape(n_pad, 1)
        dst_p = jnp.pad(dst.astype(jnp.int32), (0, pad)).reshape(n_pad, 1)
        w2_f = w2.astype(jnp.float32)

        flops = int(2 * (2 * n_pad * n_atoms_pad * 2 * h1) + 2 * n_pad * h1 * out_dim)
        bytes_acc = int(n_pad * (2 * 4 + out_dim * 4)
                        + 2 * n_atoms_pad * 2 * h1 * 4
                        + (2 * h1 + h1 * out_dim + out_dim) * 4)

        out = pl.pallas_call(
            _pool_bond_gather_kernel,
            out_shape=jax.ShapeDtypeStruct((n_pad, out_dim), out_dtype),
            grid_spec=pltpu.PrefetchScalarGridSpec(
                num_scalar_prefetch=0,
                grid=grid,
                in_specs=[
                    pl.BlockSpec((tile, 1), lambda i: (i, 0)),             # src idx
                    pl.BlockSpec((tile, 1), lambda i: (i, 0)),             # dst idx
                    pl.BlockSpec((n_atoms_pad, 2 * h1), lambda i: (0, 0)),  # G_src
                    pl.BlockSpec((n_atoms_pad, 2 * h1), lambda i: (0, 0)),  # G_dst
                    pl.BlockSpec((1, 2 * h1), lambda i: (0, 0)),            # [b1|b1]
                    pl.BlockSpec((h1, out_dim), lambda i: (0, 0)),          # W2
                    pl.BlockSpec((1, out_dim), lambda i: (0, 0)),           # 2*b2
                ],
                out_specs=pl.BlockSpec((tile, out_dim), lambda i: (i, 0)),
            ),
            compiler_params=compiler_params,
            cost_estimate=pl.CostEstimate(flops=flops, transcendentals=0,
                                          bytes_accessed=bytes_acc),
        )(src_p, dst_p, g_src, g_dst, b1f, w2_f, two_b2)

    else:
        # ---- Path B: stream x = [h_src || h_dst] as bf16, fused-W1 matmul ------
        h_c = h.astype(compute_dtype)
        x = jnp.concatenate(
            [jnp.take(h_c, src, axis=0), jnp.take(h_c, dst, axis=0)], axis=1)
        if n_pad != n_bonds:
            x = jnp.pad(x, ((0, n_pad - n_bonds), (0, 0)))
        w1f_c = w1f.astype(compute_dtype)
        w2_c = w2.astype(compute_dtype)

        dsz = jnp.dtype(compute_dtype).itemsize
        flops = int(2 * n_pad * (2 * hidden) * (2 * h1) + 2 * n_pad * h1 * out_dim)
        bytes_acc = int(n_pad * (2 * hidden * dsz + out_dim * 4)
                        + (2 * hidden * 2 * h1 + h1 * out_dim) * dsz
                        + (2 * h1 + out_dim) * 4)

        out = pl.pallas_call(
            _pool_bond_x_kernel,
            out_shape=jax.ShapeDtypeStruct((n_pad, out_dim), out_dtype),
            grid_spec=pltpu.PrefetchScalarGridSpec(
                num_scalar_prefetch=0,
                grid=grid,
                in_specs=[
                    pl.BlockSpec((tile, 2 * hidden), lambda i: (i, 0)),      # x tile
                    pl.BlockSpec((2 * hidden, 2 * h1), lambda i: (0, 0)),    # [W1|W1sw]
                    pl.BlockSpec((1, 2 * h1), lambda i: (0, 0)),             # [b1|b1]
                    pl.BlockSpec((h1, out_dim), lambda i: (0, 0)),           # W2
                    pl.BlockSpec((1, out_dim), lambda i: (0, 0)),            # 2*b2
                ],
                out_specs=pl.BlockSpec((tile, out_dim), lambda i: (i, 0)),
            ),
            compiler_params=compiler_params,
            cost_estimate=pl.CostEstimate(flops=flops, transcendentals=0,
                                          bytes_accessed=bytes_acc),
        )(x, w1f_c, b1f, w2_c, two_b2)

    # padded bond rows carry garbage — sliced off here
    return out[:n_bonds]


# ----------------------------------------------------------------------------
# Pure-JAX reference (literal translation of the module) for verification
# ----------------------------------------------------------------------------
def _reference(h, src, dst, w1, b1, w2, b2):
    def mlp(x):
        a = jnp.maximum(x @ w1 + b1, 0.0)
        return a @ w2 + b2

    h_u = h[src]
    h_v = h[dst]
    h_fwd = jnp.concatenate([h_u, h_v], axis=1)
    h_rev = jnp.concatenate([h_v, h_u], axis=1)
    return mlp(h_fwd) + mlp(h_rev)


if __name__ == "__main__":
    jax.config.update("jax_default_matmul_precision", "highest")
    key = jax.random.PRNGKey(0)
    k_h, k_src, k_dst, k_w1, k_b1, k_w2, k_b2, k_big = jax.random.split(key, 8)

    # ---- small shapes consistent with the module -----------------------------
    n_atoms = 10       # nodes in the molecule graph
    n_bonds = 9        # forward edges (bonds)
    hidden = 32        # GCN node-feature width
    h1 = 32            # hidden width of SequentialLayers
    out_dim = 16       # pooled bond-feature width

    h = jax.random.normal(k_h, (n_atoms, hidden), dtype=jnp.float32)
    src = jax.random.randint(k_src, (n_bonds,), 0, n_atoms)
    dst = jax.random.randint(k_dst, (n_bonds,), 0, n_atoms)

    w1 = jax.random.normal(k_w1, (2 * hidden, h1), dtype=jnp.float32) * 0.1
    b1 = jax.random.normal(k_b1, (h1,), dtype=jnp.float32) * 0.1
    w2 = jax.random.normal(k_w2, (h1, out_dim), dtype=jnp.float32) * 0.1
    b2 = jax.random.normal(k_b2, (out_dim,), dtype=jnp.float32) * 0.1

    # Path A (in-kernel one-hot gather, all-f32, exercised for small molecules)
    out = pool_bond_features(h, src, dst, w1, b1, w2, b2)
    out = jax.block_until_ready(out)
    ref = _reference(h, src, dst, w1, b1, w2, b2)
    assert out.shape == (n_bonds, out_dim), out.shape
    assert jnp.allclose(out, ref, atol=1e-3, rtol=1e-3), (
        float(jnp.max(jnp.abs(out - ref)))
    )

    # Path B (streamed bf16 x, fused W1) with a multi-step grid + padding
    n_bonds_big = 2500
    src_b = jax.random.randint(k_big, (n_bonds_big,), 0, n_atoms)
    dst_b = jax.random.randint(jax.random.fold_in(k_big, 1), (n_bonds_big,), 0, n_atoms)
    out_b = pool_bond_features(h, src_b, dst_b, w1, b1, w2, b2,
                               gather_in_kernel=False, tile_bonds=1024)
    out_b = jax.block_until_ready(out_b)
    ref_b = _reference(h, src_b, dst_b, w1, b1, w2, b2)
    assert out_b.shape == (n_bonds_big, out_dim), out_b.shape
    assert jnp.allclose(out_b, ref_b, atol=5e-2, rtol=5e-2), (
        float(jnp.max(jnp.abs(out_b - ref_b)))
    )

    # Empty-bond edge case (early return, no degenerate grid)
    out_e = pool_bond_features(h, src[:0], dst[:0], w1, b1, w2, b2)
    assert out_e.shape == (0, out_dim)

    print("KERNEL_OK")
</pallas_src>

<mosaic_0001>
module attributes {stable_mosaic.version = 11 : i64} {
  func.func @_pool_bond_gather_kernel(%arg0: i32, %arg1: memref<32x1xi32, #tpu.memory_space<vmem>>, %arg2: memref<32x1xi32, #tpu.memory_space<vmem>>, %arg3: memref<16x64xf32, #tpu.memory_space<vmem>>, %arg4: memref<16x64xf32, #tpu.memory_space<vmem>>, %arg5: memref<1x64xf32, #tpu.memory_space<vmem>>, %arg6: memref<32x16xf32, #tpu.memory_space<vmem>>, %arg7: memref<1x16xf32, #tpu.memory_space<vmem>>, %arg8: memref<32x16xf32, #tpu.memory_space<vmem>>) attributes {dimension_semantics = [#tpu.dimension_semantics<parallel>], iteration_bounds = array<i64: 1>, scalar_prefetch = 0 : i64, scratch_operands = 0 : i64, tpu.core_type = #tpu.core_type<tc>, window_params = [{transform_indices = @transform_0, window_bounds = array<i64: 32, 1>}, {transform_indices = @transform_1, window_bounds = array<i64: 32, 1>}, {pipeline_mode = #tpu.pipeline_mode<synchronous>, transform_indices = @transform_2, window_bounds = array<i64: 16, 64>}, {pipeline_mode = #tpu.pipeline_mode<synchronous>, transform_indices = @transform_3, window_bounds = array<i64: 16, 64>}, {pipeline_mode = #tpu.pipeline_mode<synchronous>, transform_indices = @transform_4, window_bounds = array<i64: 1, 64>}, {pipeline_mode = #tpu.pipeline_mode<synchronous>, transform_indices = @transform_5, window_bounds = array<i64: 32, 16>}, {pipeline_mode = #tpu.pipeline_mode<synchronous>, transform_indices = @transform_6, window_bounds = array<i64: 1, 16>}, {transform_indices = @transform_7, window_bounds = array<i64: 32, 16>}]} {
    %0 = tpu.iota {dimensions = array<i32: 1>} : vector<32x16xi32>
    %c0 = arith.constant 0 : index
    %c0_0 = arith.constant 0 : index
    %1 = vector.load %arg1[%c0, %c0_0] : memref<32x1xi32, #tpu.memory_space<vmem>>, vector<32x1xi32>
    %2 = vector.broadcast %1 : vector<32x1xi32> to vector<32x16xi32>
    %3 = arith.cmpi eq, %0, %2 : vector<32x16xi32>
    %4 = arith.extui %3 : vector<32x16xi1> to vector<32x16xi32>
    %5 = arith.sitofp %4 : vector<32x16xi32> to vector<32x16xf32>
    %c0_1 = arith.constant 0 : index
    %c0_2 = arith.constant 0 : index
    %6 = vector.load %arg2[%c0_1, %c0_2] : memref<32x1xi32, #tpu.memory_space<vmem>>, vector<32x1xi32>
    %7 = vector.broadcast %6 : vector<32x1xi32> to vector<32x16xi32>
    %8 = arith.cmpi eq, %0, %7 : vector<32x16xi32>
    %9 = arith.extui %8 : vector<32x16xi1> to vector<32x16xi32>
    %10 = arith.sitofp %9 : vector<32x16xi32> to vector<32x16xf32>
    %c0_3 = arith.constant 0 : index
    %c0_4 = arith.constant 0 : index
    %11 = vector.load %arg3[%c0_3, %c0_4] : memref<16x64xf32, #tpu.memory_space<vmem>>, vector<16x64xf32>
    %cst = arith.constant dense<0.000000e+00> : vector<32x64xf32>
    %12 = tpu.matmul %5, %11, %cst {dimension_numbers = #tpu.dot_dimension_numbers<[1], [0], [0], [1], [0, 0, 1, 1], [], []>, precision = #tpu.contract_precision<fp32>} : vector<32x16xf32>, vector<16x64xf32>, vector<32x64xf32> -> vector<32x64xf32>
    %c0_5 = arith.constant 0 : index
    %c0_6 = arith.constant 0 : index
    %13 = vector.load %arg4[%c0_5, %c0_6] : memref<16x64xf32, #tpu.memory_space<vmem>>, vector<16x64xf32>
    %cst_7 = arith.constant dense<0.000000e+00> : vector<32x64xf32>
    %14 = tpu.matmul %10, %13, %cst_7 {dimension_numbers = #tpu.dot_dimension_numbers<[1], [0], [0], [1], [0, 0, 1, 1], [], []>, precision = #tpu.contract_precision<fp32>} : vector<32x16xf32>, vector<16x64xf32>, vector<32x64xf32> -> vector<32x64xf32>
    %15 = arith.addf %12, %14 : vector<32x64xf32>
    %c0_8 = arith.constant 0 : index
    %c0_9 = arith.constant 0 : index
    %16 = vector.load %arg5[%c0_8, %c0_9] : memref<1x64xf32, #tpu.memory_space<vmem>>, vector<1x64xf32>
    %17 = vector.broadcast %16 : vector<1x64xf32> to vector<32x64xf32>
    %18 = arith.addf %15, %17 : vector<32x64xf32>
    %19 = vector.extract_strided_slice %18 {offsets = [0, 0], sizes = [32, 32], strides = [1, 1]} : vector<32x64xf32> to vector<32x32xf32>
    %cst_10 = arith.constant 0.000000e+00 : f32
    %20 = vector.broadcast %cst_10 : f32 to vector<32x32xf32>
    %21 = arith.maximumf %19, %20 : vector<32x32xf32>
    %22 = vector.extract_strided_slice %18 {offsets = [0, 32], sizes = [32, 32], strides = [1, 1]} : vector<32x64xf32> to vector<32x32xf32>
    %cst_11 = arith.constant 0.000000e+00 : f32
    %23 = vector.broadcast %cst_11 : f32 to vector<32x32xf32>
    %24 = arith.maximumf %22, %23 : vector<32x32xf32>
    %25 = arith.addf %21, %24 : vector<32x32xf32>
    %c0_12 = arith.constant 0 : index
    %c0_13 = arith.constant 0 : index
    %26 = vector.load %arg6[%c0_12, %c0_13] : memref<32x16xf32, #tpu.memory_space<vmem>>, vector<32x16xf32>
    %cst_14 = arith.constant dense<0.000000e+00> : vector<32x16xf32>
    %27 = tpu.matmul %25, %26, %cst_14 {dimension_numbers = #tpu.dot_dimension_numbers<[1], [0], [0], [1], [0, 0, 1, 1], [], []>, precision = #tpu.contract_precision<fp32>} : vector<32x32xf32>, vector<32x16xf32>, vector<32x16xf32> -> vector<32x16xf32>
    %c0_15 = arith.constant 0 : index
    %c0_16 = arith.constant 0 : index
    %28 = vector.load %arg7[%c0_15, %c0_16] : memref<1x16xf32, #tpu.memory_space<vmem>>, vector<1x16xf32>
    %29 = vector.broadcast %28 : vector<1x16xf32> to vector<32x16xf32>
    %30 = arith.addf %27, %29 : vector<32x16xf32>
    %c0_17 = arith.constant 0 : index
    %c0_18 = arith.constant 0 : index
    %31 = vector.load %arg8[%c0_17, %c0_18] : memref<32x16xf32, #tpu.memory_space<vmem>>, vector<32x16xf32>
    tpu.vector_store %arg8[%c0_17, %c0_18], %30 {strides = array<i32>} : memref<32x16xf32, #tpu.memory_space<vmem>>, vector<32x16xf32>,
    return
  }
  func.func @transform_0(%arg0: i32) -> (i32, i32) {
    %c0_i32 = arith.constant 0 : i32
    %c0_i32_0 = arith.constant 0 : i32
    return %arg0, %c0_i32 : i32, i32
  }
  func.func @transform_1(%arg0: i32) -> (i32, i32) {
    %c0_i32 = arith.constant 0 : i32
    %c0_i32_0 = arith.constant 0 : i32
    return %arg0, %c0_i32 : i32, i32
  }
  func.func @transform_2(%arg0: i32) -> (i32, i32) {
    %c0_i32 = arith.constant 0 : i32
    %c0_i32_0 = arith.constant 0 : i32
    %c0_i32_1 = arith.constant 0 : i32
    return %c0_i32, %c0_i32_0 : i32, i32
  }
  func.func @transform_3(%arg0: i32) -> (i32, i32) {
    %c0_i32 = arith.constant 0 : i32
    %c0_i32_0 = arith.constant 0 : i32
    %c0_i32_1 = arith.constant 0 : i32
    return %c0_i32, %c0_i32_0 : i32, i32
  }
  func.func @transform_4(%arg0: i32) -> (i32, i32) {
    %c0_i32 = arith.constant 0 : i32
    %c0_i32_0 = arith.constant 0 : i32
    %c0_i32_1 = arith.constant 0 : i32
    return %c0_i32, %c0_i32_0 : i32, i32
  }
  func.func @transform_5(%arg0: i32) -> (i32, i32) {
    %c0_i32 = arith.constant 0 : i32
    %c0_i32_0 = arith.constant 0 : i32
    %c0_i32_1 = arith.constant 0 : i32
    return %c0_i32, %c0_i32_0 : i32, i32
  }
  func.func @transform_6(%arg0: i32) -> (i32, i32) {
    %c0_i32 = arith.constant 0 : i32
    %c0_i32_0 = arith.constant 0 : i32
    %c0_i32_1 = arith.constant 0 : i32
    return %c0_i32, %c0_i32_0 : i32, i32
  }
  func.func @transform_7(%arg0: i32) -> (i32, i32) {
    %c0_i32 = arith.constant 0 : i32
    %c0_i32_0 = arith.constant 0 : i32
    return %arg0, %c0_i32 : i32, i32
  }
}

</mosaic_0001>

<bundles_post_ra>
// kernel: tpu_custom_call.1
= control target key start
LH: loop header
LB: loop body
LE: loop exit
PB: predicated region body
PF: predicated region fallthrough
CT: control target
= control target key end

     0   :  { %v1000_v0 = vmov 0   ;;  %v26_v21 = vlaneseq  ;;  %vm88_vm0 = vcmask 130048   ;;  %v1001_v29 = vmov 0.0   ;;  %s1241_s1 = inlined_call_operand.vmem [shape: s32[32,1], index: 1, kind: input, shape index: {}]   ;;  %s1242_s3 = inlined_call_operand.vmem [shape: f32[16,64], index: 3, kind: input, shape index: {}]   ;;  %s1243_s0 = inlined_call_operand.vmem [shape: s32[32,1], index: 0, kind: input, shape index: {}]   ;;  %s1244_s2 = inlined_call_operand.vmem [shape: f32[16,64], index: 2, kind: input, shape index: {}]   ;;  %s1245_s4 = inlined_call_operand.vmem [shape: f32[1,64], index: 4, kind: input, shape index: {}]   ;;  %s1246_s5 = inlined_call_operand.vmem [shape: f32[32,16], index: 5, kind: input, shape index: {}]   ;;  %s1247_s6 = inlined_call_operand.vmem [shape: f32[1,16], index: 6, kind: input, shape index: {}]   ;;  %s1248_s7 = inlined_call_operand.vmem [shape: f32[32,16], index: 7, kind: output, shape index: {}]  }
   0x1   :  { %996 = vset.pattern.permute.xlu1 %v1000_v0  ;;  %995 = vset.pattern.permute.xlu0 %v1000_v0  ;;  %v58_v1 = vld [vmem:[%s1241_s1 + $0x10] sm:$0xff]  ;;  %v56_v2 = vld [vmem:[%s1241_s1] sm:$0xff]  ;;  %v87_v4 = vld [vmem:[%s1242_s3 + $0x8] sm:$0xff]  ;;  %vm657_vm9 = vcmask 261120  }
   0x2   :  { %67 = vperm.xlu0 %995, %v58_v1   ;;  %61 = vperm.xlu1 %996, %v56_v2   ;;  %v28_v3 = vld [vmem:[%s1243_s0] sm:$0xff]  ;;  %v115_v5 = vand.u32 4294901760, %v87_v4  ;;  %v59_v7 = vld [vmem:[%s1241_s1 + $0x18] sm:$0xff]  ;;  %v57_v8 = vld [vmem:[%s1241_s1 + $0x8] sm:$0xff]  ;;  %v1076_v23 = vand.u32 127, %v26_v21 }
   0x3   :  { %997 = vset.pattern.permute.xlu2 %v1000_v0  ;;  %v29_v10 = vld [vmem:[%s1243_s0 + $0x8] sm:$0xff]  ;;  %v30_v13 = vld [vmem:[%s1243_s0 + $0x10] sm:$0xff]  ;;  %v31_v14 = vld [vmem:[%s1243_s0 + $0x18] sm:$0xff] }
   0x4   :  { %33 = vperm.xlu2 %997, %v28_v3   ;;  %v167_v6 = vsub.f32 %v87_v4, %v115_v5  ;;  %116 = vmatpush.msra.mxu0 %v115_v5  ;;  %v86_v15 = vld [vmem:[%s1242_s3] sm:$0xff]  ;;  %v85_v22 = vld [vmem:[%s1244_s2 + $0x8] sm:$0xff] }
   0x5   :  { %988 = vmatpush.msra.mxu2 %v115_v5  ;;  %v117_v16 = vand.u32 4294901760, %v86_v15  ;;  %v1078_v24 = vand.u32 4294901760, %v85_v22  ;;  %v84_v40 = vld [vmem:[%s1244_s2] sm:$0xff] }
   0x6   :  { %v168_v9 = vand.u32 4294901760, %v167_v6  ;;  %v381_v45 = vand.u32 4294901760, %v84_v40 }
   0x7   :  { %v173_v17 = vsub.f32 %v86_v15, %v117_v16  ;;  %118 = vmatpush.msra.mxu0 %v117_v16  ;;  %989 = vmatpush.msra.mxu2 %v117_v16  ;;  %v1081_v25 = vsub.f32 %v85_v22, %v1078_v24 }
   0x8   :  { %v169_v11 = vsub.f32 %v167_v6, %v168_v9  ;;  %v437_v52 = vsub.f32 %v84_v40, %v381_v45 }
   0x9   :  { %211 = vmatpush.msrb.mxu2 %v167_v6  ;;  %296 = vmatpush.msrb.mxu0 %v168_v9  ;;  %v174_v18 = vand.u32 4294901760, %v173_v17  ;;  %v432_v28 = vand.u32 4294901760, %v1081_v25 }
   0xa   :  { %70 = vperm.xlu0 %995, %v59_v7   ;;  %64 = vperm.xlu1 %996, %v57_v8   ;;  %v170_v12 = vand.u32 4294901760, %v169_v11  ;;  %v438_v55 = vand.u32 4294901760, %v437_v52 }
   0xb   :  { %214 = vmatpush.msrb.mxu2 %v173_v17  ;;  %v175_v19 = vsub.f32 %v173_v17, %v174_v18  ;;  %300 = vmatpush.msrb.mxu0 %v174_v18  ;;  %v433_v34 = vsub.f32 %v1081_v25, %v432_v28 }
   0xc   :  { %36 = vperm.xlu2 %997, %v29_v10   ;;  %171 = vmatpush.msra.mxu1 %v170_v12  ;;  %v439_v58 = vsub.f32 %v437_v52, %v438_v55 }
   0xd   :  { %990 = vmatpush.msra.mxu3 %v170_v12  ;;  %v176_v20 = vand.u32 4294901760, %v175_v19  ;;  %v434_v37 = vand.u32 4294901760, %v433_v34 }
   0xe   :  { %v440_v62 = vand.u32 4294901760, %v439_v58 }
   0xf   :  { %177 = vmatpush.msra.mxu1 %v176_v20  ;;  %991 = vmatpush.msra.mxu3 %v176_v20 }
  0x11   :  { %251 = vmatpush.msrb.mxu3 %v115_v5  ;;  %333 = vmatpush.msrb.mxu1 %v115_v5 }
  0x12   :  { %39 = vperm.xlu0 %995, %v30_v13   ;;  %42 = vperm.xlu1 %996, %v31_v14  }
  0x13   :  { %253 = vmatpush.msrb.mxu3 %v117_v16  ;;  %335 = vmatpush.msrb.mxu1 %v117_v16 }
  0x5e   :  { %v34_v2 = vpop.permute.xlu2 %33 }
  0x5f   :  { %vm44_vm6 = vcmp.eq.s32.totalorder %v1076_v23, %v34_v2 }
  0x60   :  { %v956_v3 = vsel %vm44_vm6, 1.0, %v1001_v29 }
  0x61   :  { %v354_v4 = vsel %vm88_vm0, %v956_v3, 0 }
  0x62   :  { %v384_v6 = vsub.f32 %v354_v4, %v354_v4 }
  0x64   :  { %v385_v8 = vand.u32 4294901760, %v384_v6 }
  0x66   :  { %v37_v5 = vpop.permute.xlu2 %36  ;;  %v386_v12 = vsub.f32 %v384_v6, %v385_v8 }
  0x67   :  { %vm45_vm7 = vcmp.eq.s32.totalorder %v1076_v23, %v37_v5 }
  0x68   :  { %v957_v7 = vsel %vm45_vm7, 1.0, %v1001_v29  ;;  %v387_v16 = vand.u32 4294901760, %v386_v12 }
  0x69   :  { %v357_v10 = vsel %vm88_vm0, %v957_v7, 0 }
  0x6a   :  { %v392_v11 = vsub.f32 %v357_v10, %v357_v10 }
  0x6c   :  { %v393_v14 = vand.u32 4294901760, %v392_v11 }
  0x6e   :  { %v394_v18 = vsub.f32 %v392_v11, %v393_v14 }
  0x70   :  { %v395_v21 = vand.u32 4294901760, %v394_v18 }
  0x74   :  { %v68_v26 = vpop.permute.xlu0 %67  ;;  %v62_v27 = vpop.permute.xlu1 %61 }
  0x75   :  { %vm74_vm1 = vcmp.eq.s32.totalorder %v1076_v23, %v68_v26  ;;  %vm72_vm2 = vcmp.eq.s32.totalorder %v1076_v23, %v62_v27 }
  0x76   :  { %v1087_v30 = vsel %vm74_vm1, 1.0, %v1001_v29  ;;  %v960_v31 = vsel %vm72_vm2, 1.0, %v1001_v29 }
  0x77   :  { %v96_v32 = vsel %vm88_vm0, %v1087_v30, 0  ;;  %v90_v33 = vsel %vm88_vm0, %v960_v31, 0  ;;  %964 = vmatmul.msk.f32.vlgmr.msra.gmra.mxu1 %vm88_vm0, %v960_v31  ;;  %966 = vmatmul.msk.f32.vlgmr.msra.gmra.mxu3 %vm88_vm0, %v1087_v30 }
  0x78   :  { %v1099_v35 = vsub.f32 %v96_v32, %v96_v32  ;;  %v120_v36 = vsub.f32 %v90_v33, %v90_v33  ;;  %515 = vmatpush.msra.mxu1 %v1078_v24  ;;  %435 = vmatpush.msra.mxu3 %v434_v37 }
  0x7a   :  { %v121_v38 = vand.u32 4294901760, %v120_v36  ;;  %v137_v39 = vand.u32 4294901760, %v1099_v35  ;;  %517 = vmatpush.msra.mxu1 %v381_v45  ;;  %441 = vmatpush.msra.mxu3 %v440_v62 }
  0x7c   :  { %v71_v41 = vpop.permute.xlu0 %70  ;;  %v65_v42 = vpop.permute.xlu1 %64  ;;  %v122_v43 = vsub.f32 %v120_v36, %v121_v38  ;;  %v138_v44 = vsub.f32 %v1099_v35, %v137_v39 }
  0x7d   :  { %vm75_vm3 = vcmp.eq.s32.totalorder %v1076_v23, %v71_v41  ;;  %vm73_vm4 = vcmp.eq.s32.totalorder %v1076_v23, %v65_v42 }
  0x7e   :  { %v1110_v46 = vsel %vm75_vm3, 1.0, %v1001_v29  ;;  %v961_v47 = vsel %vm73_vm4, 1.0, %v1001_v29  ;;  %v123_v48 = vand.u32 4294901760, %v122_v43  ;;  %v139_v49 = vand.u32 4294901760, %v138_v44 }
  0x7f   :  { %v99_v50 = vsel %vm88_vm0, %v1110_v46, 0  ;;  %v93_v51 = vsel %vm88_vm0, %v961_v47, 0  ;;  %965 = vmatmul.msk.f32.gmra.mxu1 %vm88_vm0, %v961_v47  ;;  %967 = vmatmul.msk.f32.gmra.mxu3 %vm88_vm0, %v1110_v46 }
  0x80   :  { %v144_v53 = vsub.f32 %v99_v50, %v99_v50  ;;  %v128_v54 = vsub.f32 %v93_v51, %v93_v51  ;;  %124 = vmatmul.f32.vlgmr.msra.gmra.mxu0 %v123_v48  ;;  %140 = vmatmul.f32.vlgmr.msra.gmra.mxu2 %v139_v49 }
  0x81   :  { %380 = vmatpush.msra.mxu2 %v1078_v24  ;;  %475 = vmatpush.msra.mxu0 %v1081_v25 }
  0x82   :  { %v129_v56 = vand.u32 4294901760, %v128_v54  ;;  %v145_v57 = vand.u32 4294901760, %v144_v53 }
  0x83   :  { %382 = vmatpush.msra.mxu2 %v381_v45  ;;  %478 = vmatpush.msra.mxu0 %v437_v52 }
  0x84   :  { %v130_v59 = vsub.f32 %v128_v54, %v129_v56  ;;  %v146_v60 = vsub.f32 %v144_v53, %v145_v57  ;;  %v43_v61 = vpop.permute.xlu1 %42  ;;  %v40_v9 = vpop.permute.xlu0 %39 }
  0x85   :  { %vm47_vm5 = vcmp.eq.s32.totalorder %v1076_v23, %v43_v61  ;;  %vm46_vm8 = vcmp.eq.s32.totalorder %v1076_v23, %v40_v9 }
  0x86   :  { %v131_v63 = vand.u32 4294901760, %v130_v59  ;;  %v147_v0 = vand.u32 4294901760, %v146_v60  ;;  %v1123_v1 = vsel %vm47_vm5, 1.0, %v1001_v29  ;;  %v958_v13 = vsel %vm46_vm8, 1.0, %v1001_v29 }
  0x87   :  { %257 = vmatmul.f32.vlgmr.msrb.gmra.mxu3 %v121_v38  ;;  %972 = vmatmul.msk.f32.vlgmr.msrb.gmra.mxu1 %vm88_vm0, %v960_v31  ;;  %v360_v15 = vsel %vm88_vm0, %v958_v13, 0  ;;  %v363_v20 = vsel %vm88_vm0, %v1123_v1, 0 }
  0x88   :  { %132 = vmatmul.f32.gmra.mxu0 %v131_v63  ;;  %148 = vmatmul.f32.gmra.mxu2 %v147_v0  ;;  %v400_v17 = vsub.f32 %v360_v15, %v360_v15  ;;  %v408_v22 = vsub.f32 %v363_v20, %v363_v20 }
  0x89   :  { %597 = vmatpush.msrb.mxu3 %v1078_v24 }
  0x8a   :  { %v401_v19 = vand.u32 4294901760, %v400_v17  ;;  %v409_v24 = vand.u32 4294901760, %v408_v22 }
  0x8b   :  { %599 = vmatpush.msrb.mxu3 %v381_v45 }
  0x8c   :  { %v402_v23 = vsub.f32 %v400_v17, %v401_v19  ;;  %v410_v26 = vsub.f32 %v408_v22, %v409_v24 }
  0x8e   :  { %v403_v25 = vand.u32 4294901760, %v402_v23  ;;  %v411_v27 = vand.u32 4294901760, %v410_v26  ;;  %v998_v26 = vld [vmem:[%s1245_s4] ss:$0 sm:$0xff]  ;;  %s1002_s4 = smov 96  }
  0x8f   :  { %263 = vmatmul.f32.gmra.mxu3 %v129_v56  ;;  %973 = vmatmul.msk.f32.gmra.mxu1 %vm88_vm0, %v961_v47 }
  0x90   :  { %217 = vmatmul.f32.vlgmr.msrb.gmra.mxu2 %v120_v36  ;;  %968 = vmatmul.msk.f32.vlgmr.msrb.gmra.mxu0 %vm88_vm0, %v960_v31 }
  0x91   :  { %560 = vmatpush.msrb.mxu2 %v432_v28 }
  0x93   :  { %564 = vmatpush.msrb.mxu2 %v438_v55 }
  0x97   :  { %269 = vmatmul.f32.gmra.mxu3 %v137_v39  ;;  %974 = vmatmul.msk.f32.gmra.mxu1 %vm88_vm0, %v1087_v30 }
  0x98   :  { %222 = vmatmul.f32.gmra.mxu2 %v128_v54  ;;  %969 = vmatmul.msk.f32.gmra.mxu0 %vm88_vm0, %v961_v47 }
  0x9f   :  { %275 = vmatmul.f32.gmra.mxu3 %v145_v57  ;;  %975 = vmatmul.msk.f32.gmra.mxu1 %vm88_vm0, %v1110_v46 }
  0xa0   :  { %227 = vmatmul.f32.gmra.mxu2 %v1099_v35  ;;  %970 = vmatmul.msk.f32.gmra.mxu0 %vm88_vm0, %v1087_v30 }
  0xa7   :  { %976 = vmatmul.msk.f32.vlgmr.msra.gmra.mxu3 %vm88_vm0, %v956_v3  ;;  %521 = vmatmul.f32.vlgmr.msra.gmra.mxu1 %v385_v8 }
  0xa8   :  { %232 = vmatmul.f32.gmra.mxu2 %v144_v53  ;;  %971 = vmatmul.msk.f32.gmra.mxu0 %vm88_vm0, %v1110_v46 }
  0xaf   :  { %977 = vmatmul.msk.f32.gmra.mxu3 %vm88_vm0, %v957_v7  ;;  %527 = vmatmul.f32.gmra.mxu1 %v393_v14 }
  0xb0   :  { %388 = vmatmul.f32.vlgmr.msra.gmra.mxu2 %v387_v16  ;;  %481 = vmatmul.f32.vlgmr.msra.gmra.mxu0 %v384_v6 }
  0xb7   :  { %978 = vmatmul.msk.f32.gmra.mxu3 %vm88_vm0, %v958_v13  ;;  %533 = vmatmul.f32.gmra.mxu1 %v401_v19 }
  0xb8   :  { %396 = vmatmul.f32.gmra.mxu2 %v395_v21  ;;  %486 = vmatmul.f32.gmra.mxu0 %v392_v11 }
  0xbf   :  { %979 = vmatmul.msk.f32.gmra.mxu3 %vm88_vm0, %v1123_v1  ;;  %539 = vmatmul.f32.gmra.mxu1 %v409_v24 }
  0xc0   :  { %404 = vmatmul.f32.gmra.mxu2 %v403_v25  ;;  %491 = vmatmul.f32.gmra.mxu0 %v400_v17 }
  0xc7   :  { %984 = vmatmul.msk.f32.vlgmr.msrb.gmra.mxu3 %vm88_vm0, %v956_v3 }
  0xc8   :  { %412 = vmatmul.f32.gmra.mxu2 %v411_v27  ;;  %496 = vmatmul.f32.gmra.mxu0 %v408_v22  ;;  %v652_v27 = vld [vmem:[%s1246_s5 + $0x18] sm:$0xff] }
  0xcf   :  { %985 = vmatmul.msk.f32.gmra.mxu3 %vm88_vm0, %v957_v7 }
  0xd0   :  { %980 = vmatmul.msk.f32.vlgmr.msrb.gmra.mxu2 %vm88_vm0, %v956_v3 }
  0xd7   :  { %986 = vmatmul.msk.f32.gmra.mxu3 %vm88_vm0, %v958_v13 }
  0xd8   :  { %981 = vmatmul.msk.f32.gmra.mxu2 %vm88_vm0, %v957_v7 }
  0xdf   :  { %987 = vmatmul.msk.f32.gmra.mxu3 %vm88_vm0, %v1123_v1 }
  0xe0   :  { %982 = vmatmul.msk.f32.gmra.mxu2 %vm88_vm0, %v958_v13 }
  0xe8   :  { %983 = vmatmul.msk.f32.gmra.mxu2 %vm88_vm0, %v1123_v1 }
  0xf4   :  { %v180_v36 = vpop.f32.mrf.mxu1 }
  0xfa   :  { %v188_v28 = vpop.f32.mrf.mxu3 }
  0xfc   :  { %v184_v40 = vpop.f32.mrf.mxu1 }
  0xfd   :  { %v125_v33 = vpop.f32.mrf.mxu0 }
  0xfe   :  { %v181_v54 = vadd.f32 %v180_v36, %v125_v33 }
 0x102   :  { %v192_v29 = vpop.f32.mrf.mxu3 }
 0x103   :  { %v141_v30 = vpop.f32.mrf.mxu2 }
 0x104   :  { %v189_v31 = vadd.f32 %v188_v28, %v141_v30  ;;  %v338_v45 = vpop.f32.mrf.mxu1 }
 0x105   :  { %v133_v39 = vpop.f32.mrf.mxu0 }
 0x106   :  { %v185_v61 = vadd.f32 %v184_v40, %v133_v39 }
 0x10a   :  { %v258_v32 = vpop.f32.mrf.mxu3 }
 0x10b   :  { %v149_v34 = vpop.f32.mrf.mxu2 }
 0x10c   :  { %v193_v35 = vadd.f32 %v192_v29, %v149_v34  ;;  %v342_v50 = vpop.f32.mrf.mxu1  ;;  %v1173_v29 = vand.u32 4294901760, %v652_v27 }
 0x10d   :  { %v303_v43 = vpop.f32.mrf.mxu0 }
 0x10e   :  { %v1176_v33 = vsub.f32 %v652_v27, %v1173_v29  ;;  %834 = vmatpush.msra.mxu3 %v1173_v29  ;;  %683 = vmatpush.msrb.mxu0 %v1173_v29 }
 0x110   :  { %790 = vmatpush.msra.mxu2 %v1176_v33 }
 0x112   :  { %v264_v37 = vpop.f32.mrf.mxu3 }
 0x113   :  { %v218_v38 = vpop.f32.mrf.mxu2 }
 0x114   :  { %v346_v55 = vpop.f32.mrf.mxu1  ;;  %v219_v56 = vadd.f32 %v218_v38, %v181_v54 }
 0x115   :  { %v307_v47 = vpop.f32.mrf.mxu0 }
 0x116   :  { %v259_v59 = vadd.f32 %v258_v32, %v219_v56 }
 0x118   :  { %v304_v63 = vadd.f32 %v303_v43, %v259_v59 }
 0x11a   :  { %v270_v41 = vpop.f32.mrf.mxu3  ;;  %v339_v3 = vadd.f32 %v338_v45, %v304_v63 }
 0x11b   :  { %v223_v42 = vpop.f32.mrf.mxu2 }
 0x11c   :  { %v224_v62 = vadd.f32 %v223_v42, %v185_v61  ;;  %v350_v0 = vpop.f32.mrf.mxu1 }
 0x11d   :  { %v311_v52 = vpop.f32.mrf.mxu0 }
 0x11e   :  { %v265_v2 = vadd.f32 %v264_v37, %v224_v62  ;;  %v737_v37 = vand.u32 4294901760, %v1176_v33 }
 0x120   :  { %v308_v8 = vadd.f32 %v307_v47, %v265_v2  ;;  %v738_v43 = vsub.f32 %v1176_v33, %v737_v37 }
 0x122   :  { %v276_v44 = vpop.f32.mrf.mxu3  ;;  %v343_v13 = vadd.f32 %v342_v50, %v308_v8 }
 0x123   :  { %v228_v46 = vpop.f32.mrf.mxu2 }
 0x124   :  { %v229_v7 = vadd.f32 %v228_v46, %v189_v31  ;;  %v522_v10 = vpop.f32.mrf.mxu1  ;;  %v739_v46 = vand.u32 4294901760, %v738_v43 }
 0x125   :  { %v315_v60 = vpop.f32.mrf.mxu0 }
 0x126   :  { %v271_v12 = vadd.f32 %v270_v41, %v229_v7  ;;  %740 = vmatpush.msrb.mxu1 %v739_v46  ;;  %v651_v7 = vld [vmem:[%s1246_s5 + $0x10] sm:$0xff] }
 0x127   :  { %v684_v8 = vand.u32 4294901760, %v651_v7 }
 0x128   :  { %v312_v18 = vadd.f32 %v311_v52, %v271_v12  ;;  %v649_v12 = vld [vmem:[%s1246_s5] sm:$0xff] }
 0x129   :  { %836 = vmatpush.msra.mxu3 %v684_v8  ;;  %685 = vmatpush.msrb.mxu0 %v684_v8 }
 0x12a   :  { %v444_v48 = vpop.f32.mrf.mxu3  ;;  %v347_v24 = vadd.f32 %v346_v55, %v312_v18 }
 0x12b   :  { %v233_v49 = vpop.f32.mrf.mxu2 }
 0x12c   :  { %v234_v17 = vadd.f32 %v233_v49, %v193_v35  ;;  %v528_v28 = vpop.f32.mrf.mxu1 }
 0x12d   :  { %v482_v6 = vpop.f32.mrf.mxu0 }
 0x12e   :  { %v277_v23 = vadd.f32 %v276_v44, %v234_v17 }
 0x130   :  { %v316_v34 = vadd.f32 %v315_v60, %v277_v23 }
 0x132   :  { %v448_v51 = vpop.f32.mrf.mxu3  ;;  %v351_v44 = vadd.f32 %v350_v0, %v316_v34 }
 0x133   :  { %v389_v53 = vpop.f32.mrf.mxu2 }
 0x134   :  { %v390_v5 = vadd.f32 %v389_v53, %v339_v3  ;;  %v534_v50 = vpop.f32.mrf.mxu1 }
 0x135   :  { %v487_v19 = vpop.f32.mrf.mxu0 }
 0x136   :  { %v445_v9 = vadd.f32 %v444_v48, %v390_v5 }
 0x138   :  { %v483_v15 = vadd.f32 %v482_v6, %v445_v9  ;;  %v650_v9 = vld [vmem:[%s1246_s5 + $0x8] sm:$0xff] }
 0x13a   :  { %v452_v57 = vpop.f32.mrf.mxu3  ;;  %v523_v21 = vadd.f32 %v522_v10, %v483_v15  ;;  %v742_v10 = vsub.f32 %v651_v7, %v684_v8  ;;  %v688_v15 = vand.u32 4294901760, %v649_v12 }
 0x13b   :  { %v397_v58 = vpop.f32.mrf.mxu2 }
 0x13c   :  { %v398_v14 = vadd.f32 %v397_v58, %v343_v13  ;;  %v540_v62 = vpop.f32.mrf.mxu1  ;;  %v743_v13 = vand.u32 4294901760, %v742_v10  ;;  %793 = vmatpush.msra.mxu2 %v742_v10  ;;  %v754_v18 = vsub.f32 %v649_v12, %v688_v15 }
 0x13d   :  { %v492_v41 = vpop.f32.mrf.mxu0 }
 0x13e   :  { %v449_v20 = vadd.f32 %v448_v51, %v398_v14 }
 0x140   :  { %v488_v32 = vadd.f32 %v487_v19, %v449_v20 }
 0x142   :  { %v456_v4 = vpop.f32.mrf.mxu3  ;;  %v529_v39 = vadd.f32 %v528_v28, %v488_v32 }
 0x143   :  { %v405_v1 = vpop.f32.mrf.mxu2 }
 0x144   :  { %v406_v30 = vadd.f32 %v405_v1, %v347_v24 }
 0x145   :  { %v497_v58 = vpop.f32.mrf.mxu0 }
 0x146   :  { %v453_v38 = vadd.f32 %v452_v57, %v406_v30 }
 0x148   :  { %v493_v49 = vadd.f32 %v492_v41, %v453_v38 }
 0x14a   :  { %v602_v16 = vpop.f32.mrf.mxu3  ;;  %v535_v53 = vadd.f32 %v534_v50, %v493_v49 }
 0x14b   :  { %v413_v11 = vpop.f32.mrf.mxu2 }
 0x14c   :  { %v414_v47 = vadd.f32 %v413_v11, %v351_v44  ;;  %v686_v11 = vand.u32 4294901760, %v650_v9 }
 0x14e   :  { %v457_v52 = vadd.f32 %v456_v4, %v414_v47  ;;  %v748_v14 = vsub.f32 %v650_v9, %v686_v11  ;;  %838 = vmatpush.msra.mxu3 %v686_v11  ;;  %687 = vmatpush.msrb.mxu0 %v686_v11 }
 0x150   :  { %v498_v60 = vadd.f32 %v497_v58, %v457_v52  ;;  %v749_v17 = vand.u32 4294901760, %v748_v14  ;;  %796 = vmatpush.msra.mxu2 %v748_v14  ;;  %840 = vmatpush.msra.mxu3 %v688_v15 }
 0x151   :  { %689 = vmatpush.msrb.mxu0 %v688_v15 }
 0x152   :  { %v606_v36 = vpop.f32.mrf.mxu3  ;;  %v541_v63 = vadd.f32 %v540_v62, %v498_v60  ;;  %v750_v20 = vsub.f32 %v748_v14, %v749_v17  ;;  %799 = vmatpush.msra.mxu2 %v754_v18  ;;  %v999_v62 = vld [vmem:[%s1247_s6] ss:$0 sm:$0xff] }
 0x153   :  { %v567_v22 = vpop.f32.mrf.mxu2  ;;  %881 = vmatpush.msra.mxu0 %v737_v37 }
 0x154   :  { %v568_v25 = vadd.f32 %v567_v22, %v523_v21  ;;  %v755_v21 = vand.u32 4294901760, %v754_v18  ;;  %v751_v22 = vand.u32 4294901760, %v750_v20 }
 0x155   :  { %885 = vmatpush.msra.mxu0 %v743_v13 }
 0x156   :  { %v603_v31 = vadd.f32 %v602_v16, %v568_v25  ;;  %v744_v16 = vsub.f32 %v742_v10, %v743_v13  ;;  %v756_v23 = vsub.f32 %v754_v18, %v755_v21 }
 0x157   :  { %889 = vmatpush.msra.mxu0 %v749_v17 }
 0x158   :  { %v1180_v35 = vadd.f32 %v998_v26, %v603_v31  ;;  %v745_v19 = vand.u32 4294901760, %v744_v16  ;;  %v757_v24 = vand.u32 4294901760, %v756_v23 }
 0x159   :  { %893 = vmatpush.msra.mxu0 %v755_v21 }
 0x15a   :  { %v625_v40 = vmax.f32 %v1180_v35, 0.0  ;;  %v610_v55 = vpop.f32.mrf.mxu3  ;;  %746 = vmatpush.msrb.mxu1 %v745_v19 }
 0x15b   :  { %v571_v42 = vpop.f32.mrf.mxu2 }
 0x15c   :  { %v572_v45 = vadd.f32 %v571_v42, %v529_v39  ;;  %633 = vrot.lane.b32.xlu2 %v625_v40, %s1002_s4  ;;  %752 = vmatpush.msrb.mxu1 %v751_v22 }
 0x15e   :  { %v607_v48 = vadd.f32 %v606_v36, %v572_v45  ;;  %758 = vmatpush.msrb.mxu1 %v757_v24 }
 0x160   :  { %v1190_v51 = vadd.f32 %v998_v26, %v607_v48  ;;  %924 = vmatpush.msra.mxu1 %v1173_v29 }
 0x162   :  { %v626_v54 = vmax.f32 %v1190_v51, 0.0  ;;  %v614_v3 = vpop.f32.mrf.mxu3  ;;  %926 = vmatpush.msra.mxu1 %v684_v8 }
 0x163   :  { %v575_v56 = vpop.f32.mrf.mxu2 }
 0x164   :  { %v576_v57 = vadd.f32 %v575_v56, %v535_v53  ;;  %635 = vrot.lane.b32.xlu0 %v626_v54, %s1002_s4  ;;  %928 = vmatpush.msra.mxu1 %v686_v11 }
 0x166   :  { %v611_v59 = vadd.f32 %v610_v55, %v576_v57  ;;  %930 = vmatpush.msra.mxu1 %v688_v15 }
 0x168   :  { %v1195_v61 = vadd.f32 %v998_v26, %v611_v59 }
 0x16a   :  { %v627_v0 = vmax.f32 %v1195_v61, 0.0 }
 0x16b   :  { %v579_v1 = vpop.f32.mrf.mxu2 }
 0x16c   :  { %v580_v2 = vadd.f32 %v579_v1, %v541_v63  ;;  %637 = vrot.lane.b32.xlu1 %v627_v0, %s1002_s4 }
 0x16e   :  { %v615_v4 = vadd.f32 %v614_v3, %v580_v2 }
 0x170   :  { %v624_v5 = vadd.f32 %v998_v26, %v615_v4 }
 0x172   :  { %v628_v6 = vmax.f32 %v624_v5, 0.0 }
 0x174   :  { %639 = vrot.lane.b32.xlu2 %v628_v6, %s1002_s4 }
 0x1b6   :  { %v634_v25 = vpop.permute.xlu2 %633 }
 0x1b7   :  { %v645_v26 = vadd.f32 %v634_v25, %v625_v40 }
 0x1b9   :  { %v659_v27 = vsel %vm657_vm9, %v645_v26, 0 }
 0x1ba   :  { %v690_v28 = vand.u32 4294901760, %v659_v27 }
 0x1bc   :  { %v691_v30 = vsub.f32 %v659_v27, %v690_v28  ;;  %760 = vmatmul.f32.vlgmr.msrb.gmra.mxu1 %v690_v28 }
 0x1be   :  { %802 = vmatmul.f32.vlgmr.msra.gmra.mxu2 %v691_v30  ;;  %v692_v31 = vand.u32 4294901760, %v691_v30 }
 0x1c0   :  { %844 = vmatmul.f32.vlgmr.msra.gmra.mxu3 %v692_v31  ;;  %v693_v32 = vsub.f32 %v691_v30, %v692_v31 }
 0x1c2   :  { %v694_v33 = vand.u32 4294901760, %v693_v32 }
 0x1c4   :  { %695 = vmatmul.f32.vlgmr.msrb.gmra.mxu0 %v694_v33 }
 0x1ce   :  { %v640_v36 = vpop.permute.xlu2 %639 }
 0x1cf   :  { %v648_v38 = vadd.f32 %v640_v36, %v628_v6 }
 0x1d1   :  { %v668_v42 = vsel %vm657_vm9, %v648_v38, 0 }
 0x1d2   :  { %v714_v46 = vand.u32 4294901760, %v668_v42 }
 0x1d4   :  { %v715_v50 = vsub.f32 %v668_v42, %v714_v46 }
 0x1d6   :  { %v636_v29 = vpop.permute.xlu0 %635 }
 0x1d7   :  { %v646_v34 = vadd.f32 %v636_v29, %v626_v54  ;;  %v716_v54 = vand.u32 4294901760, %v715_v50 }
 0x1d9   :  { %v662_v37 = vsel %vm657_vm9, %v646_v34, 0  ;;  %v717_v55 = vsub.f32 %v715_v50, %v716_v54 }
 0x1da   :  { %v698_v35 = vand.u32 4294901760, %v662_v37 }
 0x1db   :  { %v718_v56 = vand.u32 4294901760, %v717_v55 }
 0x1dc   :  { %v699_v39 = vsub.f32 %v662_v37, %v698_v35  ;;  %764 = vmatmul.f32.gmra.mxu1 %v698_v35 }
 0x1de   :  { %v638_v40 = vpop.permute.xlu1 %637  ;;  %807 = vmatmul.f32.gmra.mxu2 %v699_v39  ;;  %v700_v41 = vand.u32 4294901760, %v699_v39 }
 0x1df   :  { %v647_v43 = vadd.f32 %v638_v40, %v627_v0 }
 0x1e0   :  { %850 = vmatmul.f32.gmra.mxu3 %v700_v41  ;;  %v701_v44 = vsub.f32 %v699_v39, %v700_v41 }
 0x1e1   :  { %v665_v45 = vsel %vm657_vm9, %v647_v43, 0 }
 0x1e2   :  { %v706_v47 = vand.u32 4294901760, %v665_v45  ;;  %v702_v48 = vand.u32 4294901760, %v701_v44 }
 0x1e4   :  { %v707_v49 = vsub.f32 %v665_v45, %v706_v47  ;;  %703 = vmatmul.f32.gmra.mxu0 %v702_v48  ;;  %768 = vmatmul.f32.gmra.mxu1 %v706_v47 }
 0x1e6   :  { %812 = vmatmul.f32.gmra.mxu2 %v707_v49  ;;  %v708_v51 = vand.u32 4294901760, %v707_v49 }
 0x1e8   :  { %856 = vmatmul.f32.gmra.mxu3 %v708_v51  ;;  %v709_v52 = vsub.f32 %v707_v49, %v708_v51 }
 0x1ea   :  { %v710_v53 = vand.u32 4294901760, %v709_v52 }
 0x1ec   :  { %711 = vmatmul.f32.gmra.mxu0 %v710_v53  ;;  %772 = vmatmul.f32.gmra.mxu1 %v714_v46 }
 0x1ee   :  { %817 = vmatmul.f32.gmra.mxu2 %v715_v50 }
 0x1f0   :  { %862 = vmatmul.f32.gmra.mxu3 %v716_v54 }
 0x1f4   :  { %719 = vmatmul.f32.gmra.mxu0 %v718_v56  ;;  %932 = vmatmul.f32.vlgmr.msra.gmra.mxu1 %v690_v28 }
 0x1fc   :  { %895 = vmatmul.f32.vlgmr.msra.gmra.mxu0 %v690_v28  ;;  %936 = vmatmul.f32.gmra.mxu1 %v698_v35 }
 0x204   :  { %899 = vmatmul.f32.gmra.mxu0 %v698_v35  ;;  %940 = vmatmul.f32.gmra.mxu1 %v706_v47 }
 0x20c   :  { %903 = vmatmul.f32.gmra.mxu0 %v706_v47  ;;  %944 = vmatmul.f32.gmra.mxu1 %v714_v46 }
 0x214   :  { %907 = vmatmul.f32.gmra.mxu0 %v714_v46 }
 0x239   :  { %v761_v57 = vpop.f32.mrf.mxu1 }
 0x241   :  { %v696_v58 = vpop.f32.mrf.mxu0  ;;  %v803_v2 = vpop.f32.mrf.mxu2 }
 0x242   :  { %v697_v1 = vadd.f32 %v999_v62, %v696_v58 }
 0x243   :  { %v845_v5 = vpop.f32.mrf.mxu3 }
 0x244   :  { %v762_v3 = vadd.f32 %v761_v57, %v697_v1 }
 0x246   :  { %v804_v6 = vadd.f32 %v803_v2, %v762_v3 }
 0x248   :  { %v846_v10 = vadd.f32 %v845_v5, %v804_v6 }
 0x259   :  { %v765_v59 = vpop.f32.mrf.mxu1 }
 0x261   :  { %v704_v60 = vpop.f32.mrf.mxu0  ;;  %v769_v61 = vpop.f32.mrf.mxu1 }
 0x262   :  { %v705_v7 = vadd.f32 %v999_v62, %v704_v60  ;;  %v808_v9 = vpop.f32.mrf.mxu2 }
 0x263   :  { %v851_v14 = vpop.f32.mrf.mxu3 }
 0x264   :  { %v766_v11 = vadd.f32 %v765_v59, %v705_v7 }
 0x266   :  { %v809_v15 = vadd.f32 %v808_v9, %v766_v11 }
 0x268   :  { %v852_v19 = vadd.f32 %v851_v14, %v809_v15 }
 0x269   :  { %v712_v63 = vpop.f32.mrf.mxu0  ;;  %v773_v0 = vpop.f32.mrf.mxu1 }
 0x26a   :  { %v713_v16 = vadd.f32 %v999_v62, %v712_v63  ;;  %v813_v21 = vpop.f32.mrf.mxu2 }
 0x26b   :  { %v857_v27 = vpop.f32.mrf.mxu3 }
 0x26c   :  { %v770_v20 = vadd.f32 %v769_v61, %v713_v16 }
 0x26e   :  { %v814_v24 = vadd.f32 %v813_v21, %v770_v20 }
 0x270   :  { %v858_v28 = vadd.f32 %v857_v27, %v814_v24 }
 0x271   :  { %v720_v4 = vpop.f32.mrf.mxu0  ;;  %v933_v8 = vpop.f32.mrf.mxu1 }
 0x272   :  { %v721_v25 = vadd.f32 %v999_v62, %v720_v4  ;;  %v818_v29 = vpop.f32.mrf.mxu2 }
 0x273   :  { %v863_v37 = vpop.f32.mrf.mxu3 }
 0x274   :  { %v774_v30 = vadd.f32 %v773_v0, %v721_v25 }
 0x276   :  { %v819_v34 = vadd.f32 %v818_v29, %v774_v30 }
 0x278   :  { %v864_v35 = vadd.f32 %v863_v37, %v819_v34 }
 0x279   :  { %v896_v12 = vpop.f32.mrf.mxu0  ;;  %v937_v18 = vpop.f32.mrf.mxu1 }
 0x27a   :  { %v897_v13 = vadd.f32 %v896_v12, %v846_v10 }
 0x27c   :  { %v934_v17 = vadd.f32 %v933_v8, %v897_v13 }
 0x27e   :  { %948 = vst.msk [vmem:[%s1248_s7] sm:$0xff] %vm88_vm0, %v934_v17 }
 0x281   :  { %v900_v22 = vpop.f32.mrf.mxu0  ;;  %v941_v31 = vpop.f32.mrf.mxu1 }
 0x282   :  { %v901_v23 = vadd.f32 %v900_v22, %v852_v19 }
 0x284   :  { %v938_v26 = vadd.f32 %v937_v18, %v901_v23 }
 0x286   :  { %949 = vst.msk [vmem:[%s1248_s7 + $0x8] sm:$0xff] %vm88_vm0, %v938_v26 }
 0x289   :  { %v904_v32 = vpop.f32.mrf.mxu0  ;;  %v945_v40 = vpop.f32.mrf.mxu1 }
 0x28a   :  { %v905_v33 = vadd.f32 %v904_v32, %v858_v28 }
 0x28c   :  { %v942_v36 = vadd.f32 %v941_v31, %v905_v33 }
 0x28e   :  { %950 = vst.msk [vmem:[%s1248_s7 + $0x10] sm:$0xff] %vm88_vm0, %v942_v36 }
 0x291   :  { %v908_v38 = vpop.f32.mrf.mxu0 }
 0x292   :  { %v909_v39 = vadd.f32 %v908_v38, %v864_v35 }
 0x294   :  { %v946_v41 = vadd.f32 %v945_v40, %v909_v39 }
 0x296   :  { %951 = vst.msk [vmem:[%s1248_s7 + $0x18] sm:$0xff] %vm88_vm0, %v946_v41 }

</bundles_post_ra>
